<compile_context>
chip_gen: v7x
topology: tpu7x:2x2x1
jax: 0.10.0
libtpu: 0.0.40
codegen_flags: <defaults>
</compile_context>

<pallas_src>
import jax
import jax.numpy as jnp
from jax.experimental import pallas as pl
from jax.experimental.pallas import tpu as pltpu


# Explicit scoped-VMEM budget so the same kernel is safe on v7x (64 MiB
# physical, 32 MiB default scoped) as well as v5e/v6e (128 MiB physical).
_VMEM_LIMIT_BYTES = 44 * 1024 * 1024


def _round_up(x, m):
    return (x + m - 1) // m * m


def _sublane_multiple(itemsize):
    # (8, 128) tile for 4-byte, (16, 128) for 2-byte, (32, 128) for 1-byte.
    return max(8, 32 // int(itemsize))


def _pick_batch_tile(batch, d, itemsize):
    """Batch tile: dtype-aware sublane multiple, capped at 2048 rows, aiming
    for >= 4 grid steps (both v7x TensorCores busy + pipeline overlap), and
    sized so the resident weight/bias plus the double-buffered at/ht/out
    tiles fit the VMEM budget with headroom."""
    sub = _sublane_multiple(itemsize)
    bm = _round_up(pl.cdiv(batch, 4), sub)          # ~4+ grid steps
    bm = max(sub, min(2048, bm))                    # large tiles amortize the
    #                                               # ~0.35us per-step overhead
    budget = int(0.75 * _VMEM_LIMIT_BYTES)
    resident = (2 * d * d + d) * itemsize * 2       # Wt + bias (double-buffered)
    while bm > sub and resident + 2 * 3 * bm * d * itemsize > budget:
        bm = max(sub, _round_up(bm // 2, sub))
    return bm


def _compare_sub_mul_linear_kernel(at_ref, ht_ref, w_ref, b_ref, o_ref):
    """One batch tile of: tanh(cat([(at-ht)^2, at*ht], -1) @ W_t + b).

    w_ref is the pre-transposed K-major weight (2*D, D); b_ref is f32 (1, D).
    """
    at = at_ref[...]
    ht = ht_ref[...]
    diff = at - ht
    sq = diff * diff                          # |at - ht|^2 == (at - ht)^2
    prod = at * ht
    lhs = jnp.concatenate([sq, prod], axis=-1)        # (bm, 2D), lane-contiguous
    acc = jnp.dot(lhs, w_ref[...], preferred_element_type=jnp.float32)
    acc = acc + b_ref[...]                            # (bm, D) + (1, D) broadcast
    o_ref[...] = jnp.tanh(acc).astype(o_ref.dtype)


def prepare_compare_params(wt_w, wt_b, compute_dtype=None):
    """One-time parameter prep (NOT per forward call).

    wt_w : (mem_dim, 2*mem_dim) nn.Linear weight, PyTorch (out, in) layout.
    wt_b : (mem_dim,)           nn.Linear bias.

    Returns (w_t, bias2d): w_t is the K-major (2*mem_dim, mem_dim) weight
    (optionally cast to `compute_dtype`, e.g. bf16); bias2d stays f32 since
    it is added to the f32 MXU accumulator.
    """
    w_t = jnp.transpose(wt_w)                         # (2D, D), done once
    if compute_dtype is not None:
        w_t = w_t.astype(compute_dtype)
    bias2d = wt_b.astype(jnp.float32).reshape(1, -1)  # (1, D)
    return w_t, bias2d


def compare_forward(at, ht, w_t, bias2d):
    """Default ('sub_mul_linear') forward of the PyTorch `Compare` module.

    at, ht : (mem_dim,) node vectors (as the module consumes them) or a
             batched (B, mem_dim) stack. f32 or bf16.
    w_t    : (2*mem_dim, mem_dim) pre-transposed weight from
             prepare_compare_params.
    bias2d : (1, mem_dim) f32 bias from prepare_compare_params.
    """
    squeeze = at.ndim == 1
    if squeeze:
        at = at[None, :]
        ht = ht[None, :]
    B, D = at.shape
    assert ht.shape == (B, D)
    assert w_t.shape == (2 * D, D) and bias2d.shape == (1, D)

    # Tiny-problem fallback: below roughly (64, 128) the pallas_call overhead,
    # padded MXU tiles and masked lane stores dwarf the math -- plain XLA
    # fusion is strictly faster (this covers the module's 1-D node-vector use).
    if B < 64 or D < 128:
        diff = at - ht
        lhs = jnp.concatenate([diff * diff, at * ht], axis=-1)
        out = jnp.tanh(
            jnp.dot(lhs, w_t.astype(lhs.dtype),
                    preferred_element_type=jnp.float32) + bias2d
        ).astype(at.dtype)
        return out[0] if squeeze else out

    itemsize = jnp.dtype(at.dtype).itemsize
    bm = _pick_batch_tile(B, D, itemsize)
    nb = pl.cdiv(B, bm)          # ragged last block handled by Pallas masking

    out = pl.pallas_call(
        _compare_sub_mul_linear_kernel,
        out_shape=jax.ShapeDtypeStruct((B, D), at.dtype),
        grid=(nb,),
        in_specs=[
            pl.BlockSpec((bm, D), lambda i: (i, 0)),        # at tile (pipelined)
            pl.BlockSpec((bm, D), lambda i: (i, 0)),        # ht tile (pipelined)
            pl.BlockSpec((2 * D, D), lambda i: (0, 0)),     # Wt: VMEM-resident
            pl.BlockSpec((1, D), lambda i: (0, 0)),         # bias: VMEM-resident
        ],
        out_specs=pl.BlockSpec((bm, D), lambda i: (i, 0)),
        compiler_params=pltpu.CompilerParams(
            dimension_semantics=("parallel",),   # shard batch tiles over TCs (v7x)
            vmem_limit_bytes=_VMEM_LIMIT_BYTES,
        ),
    )(at, ht, w_t, bias2d)

    return out[0] if squeeze else out


def init_linear(key, out_features, in_features, dtype=jnp.float32):
    """Deterministic init mimicking torch.nn.Linear (uniform +/- 1/sqrt(fan_in))."""
    kw, kb = jax.random.split(key)
    bound = 1.0 / jnp.sqrt(jnp.array(in_features, dtype))
    w = jax.random.uniform(kw, (out_features, in_features), dtype, -bound, bound)
    b = jax.random.uniform(kb, (out_features,), dtype, -bound, bound)
    return w, b


if __name__ == "__main__":
    key = jax.random.PRNGKey(0)

    # Case 1: batched node-vector stack, lane-dense mem_dim, f32.
    # B=200 -> bm=56, 4-step ragged grid (last block masked).
    mem_dim, batch = 128, 200
    k1, k2, k3, key = jax.random.split(key, 4)
    at = jax.random.normal(k1, (batch, mem_dim), jnp.float32)
    ht = jax.random.normal(k2, (batch, mem_dim), jnp.float32)
    wt_w, wt_b = init_linear(k3, mem_dim, 2 * mem_dim)

    ref = jnp.tanh(
        jnp.concatenate([(at - ht) ** 2, at * ht], axis=-1) @ wt_w.T + wt_b)

    w_t, b2 = prepare_compare_params(wt_w, wt_b)                 # one-time prep
    out = jax.block_until_ready(compare_forward(at, ht, w_t, b2))
    assert out.shape == (batch, mem_dim)
    assert jnp.allclose(out, ref, atol=1e-5, rtol=1e-5)

    # Case 2: same problem in bf16 (halved HBM traffic, f32 accumulation).
    w_t_bf, b2_bf = prepare_compare_params(wt_w, wt_b, compute_dtype=jnp.bfloat16)
    out_bf = jax.block_until_ready(
        compare_forward(at.astype(jnp.bfloat16), ht.astype(jnp.bfloat16),
                        w_t_bf, b2_bf))
    assert out_bf.shape == (batch, mem_dim) and out_bf.dtype == jnp.bfloat16
    assert jnp.allclose(out_bf.astype(jnp.float32), ref, atol=5e-2, rtol=5e-2)

    # Case 3: single 1-D node vectors, exactly as the PyTorch module is called.
    # This takes the small-input jnp fallback (not the Pallas kernel).
    mem_dim2 = 32
    k4, k5, k6 = jax.random.split(key, 3)
    at1 = jax.random.normal(k4, (mem_dim2,), jnp.float32)
    ht1 = jax.random.normal(k5, (mem_dim2,), jnp.float32)
    w2, bv2 = init_linear(k6, mem_dim2, 2 * mem_dim2)
    w2_t, b2_t = prepare_compare_params(w2, bv2)
    out1 = jax.block_until_ready(compare_forward(at1, ht1, w2_t, b2_t))
    ref1 = jnp.tanh(
        jnp.concatenate([(at1 - ht1) ** 2, at1 * ht1], axis=0) @ w2.T + bv2)
    assert out1.shape == (mem_dim2,)
    assert jnp.allclose(out1, ref1, atol=1e-5, rtol=1e-5)

    print("KERNEL_OK")
</pallas_src>

<mosaic_0001>
module attributes {stable_mosaic.version = 11 : i64} {
  func.func @_compare_sub_mul_linear_kernel(%arg0: i32, %arg1: memref<56x128xf32, #tpu.memory_space<vmem>>, %arg2: memref<56x128xf32, #tpu.memory_space<vmem>>, %arg3: memref<256x128xf32, #tpu.memory_space<vmem>>, %arg4: memref<1x128xf32, #tpu.memory_space<vmem>>, %arg5: memref<56x128xf32, #tpu.memory_space<vmem>>) attributes {dimension_semantics = [#tpu.dimension_semantics<parallel>], iteration_bounds = array<i64: 4>, scalar_prefetch = 0 : i64, scratch_operands = 0 : i64, tpu.core_type = #tpu.core_type<tc>, window_params = [{transform_indices = @transform_0, window_bounds = array<i64: 56, 128>}, {transform_indices = @transform_1, window_bounds = array<i64: 56, 128>}, {pipeline_mode = #tpu.pipeline_mode<synchronous>, transform_indices = @transform_2, window_bounds = array<i64: 256, 128>}, {pipeline_mode = #tpu.pipeline_mode<synchronous>, transform_indices = @transform_3, window_bounds = array<i64: 1, 128>}, {transform_indices = @transform_4, window_bounds = array<i64: 56, 128>}]} {
    %c0 = arith.constant 0 : index
    %c0_0 = arith.constant 0 : index
    %0 = vector.load %arg1[%c0, %c0_0] : memref<56x128xf32, #tpu.memory_space<vmem>>, vector<56x128xf32>
    %c0_1 = arith.constant 0 : index
    %c0_2 = arith.constant 0 : index
    %1 = vector.load %arg2[%c0_1, %c0_2] : memref<56x128xf32, #tpu.memory_space<vmem>>, vector<56x128xf32>
    %2 = arith.subf %0, %1 : vector<56x128xf32>
    %3 = arith.mulf %2, %2 : vector<56x128xf32>
    %4 = arith.mulf %0, %1 : vector<56x128xf32>
    %5 = tpu.concatenate %3, %4 in 1 : vector<56x128xf32>, vector<56x128xf32> -> vector<56x256xf32>
    %c0_3 = arith.constant 0 : index
    %c0_4 = arith.constant 0 : index
    %6 = vector.load %arg3[%c0_3, %c0_4] : memref<256x128xf32, #tpu.memory_space<vmem>>, vector<256x128xf32>
    %cst = arith.constant dense<0.000000e+00> : vector<56x128xf32>
    %7 = tpu.matmul %5, %6, %cst {dimension_numbers = #tpu.dot_dimension_numbers<[1], [0], [0], [1], [0, 0, 1, 1], [], []>} : vector<56x256xf32>, vector<256x128xf32>, vector<56x128xf32> -> vector<56x128xf32>
    %c0_5 = arith.constant 0 : index
    %c0_6 = arith.constant 0 : index
    %8 = vector.load %arg4[%c0_5, %c0_6] : memref<1x128xf32, #tpu.memory_space<vmem>>, vector<1x128xf32>
    %9 = vector.broadcast %8 : vector<1x128xf32> to vector<56x128xf32>
    %10 = arith.addf %7, %9 : vector<56x128xf32>
    %11 = math.tanh %10 : vector<56x128xf32>
    %c0_7 = arith.constant 0 : index
    %c0_8 = arith.constant 0 : index
    %12 = vector.load %arg5[%c0_7, %c0_8] : memref<56x128xf32, #tpu.memory_space<vmem>>, vector<56x128xf32>
    tpu.vector_store %arg5[%c0_7, %c0_8], %11 {strides = array<i32>} : memref<56x128xf32, #tpu.memory_space<vmem>>, vector<56x128xf32>,
    return
  }
  func.func @transform_0(%arg0: i32) -> (i32, i32) {
    %c0_i32 = arith.constant 0 : i32
    %c0_i32_0 = arith.constant 0 : i32
    return %arg0, %c0_i32 : i32, i32
  }
  func.func @transform_1(%arg0: i32) -> (i32, i32) {
    %c0_i32 = arith.constant 0 : i32
    %c0_i32_0 = arith.constant 0 : i32
    return %arg0, %c0_i32 : i32, i32
  }
  func.func @transform_2(%arg0: i32) -> (i32, i32) {
    %c0_i32 = arith.constant 0 : i32
    %c0_i32_0 = arith.constant 0 : i32
    %c0_i32_1 = arith.constant 0 : i32
    return %c0_i32, %c0_i32_0 : i32, i32
  }
  func.func @transform_3(%arg0: i32) -> (i32, i32) {
    %c0_i32 = arith.constant 0 : i32
    %c0_i32_0 = arith.constant 0 : i32
    %c0_i32_1 = arith.constant 0 : i32
    return %c0_i32, %c0_i32_0 : i32, i32
  }
  func.func @transform_4(%arg0: i32) -> (i32, i32) {
    %c0_i32 = arith.constant 0 : i32
    %c0_i32_0 = arith.constant 0 : i32
    return %arg0, %c0_i32 : i32, i32
  }
}

</mosaic_0001>

<bundles_post_ra>
// kernel: tpu_custom_call.1
= control target key start
LH: loop header
LB: loop body
LE: loop exit
PB: predicated region body
PF: predicated region fallthrough
CT: control target
= control target key end

     0   :  { %9 = vsyncpa [#allocation3], 0  ;;  %s1296_s0 = inlined_call_operand.hbm [shape: f32[200,128], index: 0, kind: input, shape index: {}]   ;;  %s1297_s1 = inlined_call_operand.hbm [shape: f32[200,128], index: 1, kind: input, shape index: {}]   ;;  %s1298_s2 = inlined_call_operand.hbm [shape: f32[256,128], index: 2, kind: input, shape index: {}]   ;;  %s1299_s3 = inlined_call_operand.vmem [shape: f32[1,128], index: 3, kind: input, shape index: {}]   ;;  %s1300_s4 = inlined_call_operand.hbm [shape: f32[200,128], index: 4, kind: output, shape index: {}]  }
   0x1   :  { %11 = vsyncpa [#allocation3 + $0x1], 0 }
   0x2   :  { %12 = vsyncpa [#allocation6], 0 }
   0x3   :  { %14 = vsyncpa [#allocation6 + $0x1], 0 }
   0x4   :  { %15 = vsyncpa [#allocation4], 0 }
   0x5   :  { %17 = vsyncpa [#allocation4 + $0x1], 0  ;;  %s1011_s15 = smov 0   ;;  %s1013_s16 = smov 0  }
   0x6   :  { %s1015_s17 = smov 0   ;;  %s1017_s18 = smov 0  }
   0x7 LB: > { %s1032_s19 = sadd.s32 4294967295, %s972_s18   ;;  %s610_s20 = sadd.s32 4294967294, %s972_s18   ;;  %s972_s18 = sphi %s1017_s18, %s1321_s18   ;;  %s968_s17 = sphi %s1015_s17, %s1320_s17   ;;  %s964_s16 = sphi %s1013_s16, %s1319_s16   ;;  %s960_s15 = sphi %s1011_s15, %s1318_s15  }
   0x8   : > { %s1036_s21 = sadd.s32 1, %s972_s18   ;;  %s30_s22 = sadd.s32 1, %s968_s17 }
   0x9   : > { %s27_s23 = ssub.s32 %s972_s18, %s1036_s21  ;;  %p37_p0 = scmp.ne.s32.totalorder %s968_s17, %s964_s16 }
   0xa   : > { %p28_p1 = scmp.eq.s32.totalorder %s27_s23, 0  ;;  %p38_p2 = scmp.eq.s32.totalorder %s972_s18, 0 }
   0xb   : > { %p43_p3 = scmp.ne.s32.totalorder %s964_s16, %s960_s15  ;;  %p1301_p4 = scmp.eq.s32.totalorder %s1032_s19, 0 }
   0xc   : > { %s1048_s24 = scalar_select %p28_p1, %s968_s17, %s30_s22  }
   0xd   : > { %p1050_p5 = por %p38_p2, %p37_p0  ;;  %p1056_p6 = por %p1301_p4, %p43_p3 }
   0xe   : > { %p135_p7 = scmp.eq.s32.totalorder %s1032_s19, 3  ;;  %p141_p8 = scmp.eq.s32.totalorder %s610_s20, 3 }
   0xf   : > { %s1304_s25 = scalar_select %p1050_p5, 1, 0 }
  0x10   : > { %s1305_s26 = scalar_select %p1056_p6, 1, 0 }
  0x11   : > { %p611_p9 = scmp.ge.s32.totalorder %s972_s18, 1  ;;  %p148_p10 = scmp.lt.s32.totalorder %s972_s18, 5 }
  0x12   : > { %p1063_p11 = por %p135_p7, %p37_p0  ;;  %p1067_p12 = por %p141_p8, %p43_p3 }
  0x13   : > { %p1071_p13 = pnand %p611_p9, %p148_p10  ;;  %s974_s30 = smov [#allocation7]  }
  0x14   : > { %s1306_s27 = scalar_select %p1063_p11, 1, 0 }
  0x15   : > { %s1307_s28 = scalar_select %p1067_p12, 1, 0 }
  0x16   : > { %s1308_s29 = scalar_select %p1071_p13, 1, 0 }
  0x17   : > { %p748_p1 = pneg %p1071_p13  ;;  %s160_s5 = sshll.u32 %s974_s30, 4  ;;  %s161_s5 = int_to_ptr.vmem [resolvable:$true] %s160_s5 }
  0x18   : > { %s814_s9 = scalar_lea.hbm %s1298_s2, 4096 }
  0x19   : > { %p1079_p2 = pnand %p748_p1, %p1301_p4  ;;  %p815_p0 = scmp.ne.s32.totalorder %s1298_s2, %s814_s9 }
  0x1a   : > { %p821_p9 = scmp.lt.u32.totalorder %s814_s9, %s1298_s2 }
  0x1b   : > { %p816_p3 = pneg %p1079_p2 }
  0x1d   : > { %p817_p7 = pnand %p816_p3, %p815_p0 }
  0x1f   : > { %p818_p8 = pneg %p817_p7 }
  0x21   : > { %p823_p10 = pnand %p821_p9, %p818_p8 }
  0x23   : > { %826 = shalt.err (!%p823_p10)
}
  0x24   : > { %s827_s14 = scalar_lea.vmem %s161_s5, 4096  ;;  %p835_p11 = scmp.lt.s32.totalorder %s161_s5, %s161_s5 }
  0x25   : > { %p828_p1 = scmp.ne.s32.totalorder %s161_s5, %s827_s14  ;;  %p836_p6 = scmp.lt.s32.totalorder %s827_s14, %s827_s14 }
  0x27   : > { %p830_p4 = pnand %p828_p1, %p816_p3  ;;  %p837_p13 = por %p836_p6, %p835_p11 }
  0x29   : > { %p831_p12 = pneg %p830_p4 }
  0x2b   : > { %p838_p5 = pnand %p837_p13, %p831_p12 }
  0x2d   : > { %841 = shalt.err (!%p838_p5)
}
  0x2e   : > { %s975_s20 = smov 128   ;;  %s976_s22 = smov 8  }
  0x2f   : > { %751 = dma.hbm_to_vmem [thread:$0]  (!%p1079_p2), %s1298_s2, 4096, %s161_s5, [#allocation6], %s975_s20, %s975_s20, %s976_s22  }
  0x30   : > { %p613_p0 = scmp.ge.s32.totalorder %s972_s18, 4 }
  0x31   : > { %p1310_p7 = scmp.ne.s32.totalorder (!%p613_p0), %s1304_s25, 0 }
  0x32   : > { %173 = sbr.rel (%p613_p0) target bundleno = 129 (0x81), region = 24 }
  0x39   : > { %176 = sbr.rel (!%p1310_p7) target bundleno = 92 (0x5c), region = 28  ;;  %s177_s7 = sand.u32 (%p1310_p7), 1, %s968_s17  }
  0x3a   : > { %s182_s8 = smul.u32 (%p1310_p7), 7, %s972_s18  ;;  %s1107_s12 = scalar_lea.sflag (%p1310_p7), [#allocation3], %s177_s7 }
  0x3b   : > { %s738_s9 = smul.u32 (%p1310_p7), 56, %s177_s7 }
  0x3c   : > { %s183_s10 = ssub.s32 (%p1310_p7), 25, %s182_s8 }
  0x3d   : > { %p184_p4 = scmp.lt.s32.totalorder (%p1310_p7), %s183_s10, 7  ;;  %s181_s5 = scalar_lea.vmem (%p1310_p7), [#allocation2], %s738_s9 }
  0x40   : > { %s1323_s10 = smov (!%p184_p4, %s183_s10), 7 }
  0x41   : > { %s1104_s11 = sshll.u32 %s1323_s10, 7 }
  0x42   : > { %s188_s6 = ssub.s32 896, %s1104_s11 }
  0x43   : > { %189 = vsyncadd %s1107_s12, %s188_s6  ;;  %p615_p5 = scmp.ne.s32.totalorder %s1104_s11, 0  ;;  %s634_s13 = smul.u32 896, %s972_s18 }
  0x44   : > { %s194_s14 = sshll.u32 %s181_s5, 4  ;;  %s846_s9 = scalar_lea.hbm %s1296_s0, 3200  ;;  %s1117_s14 = int_to_ptr.vmem [resolvable:$true] %s194_s14 }
  0x45   : > { %s1115_s23 = scalar_lea.hbm %s1296_s0, %s634_s13 }
  0x46   : > { %s842_s30 = scalar_lea.hbm %s1115_s23, %s1104_s11  ;;  %p847_p13 = scmp.lt.u32.totalorder %s1115_s23, %s1296_s0 }
  0x47   : > { %p843_p6 = scmp.ne.s32.totalorder %s1115_s23, %s842_s30  ;;  %p848_p2 = scmp.lt.u32.totalorder %s846_s9, %s842_s30 }
  0x48   : > { %p850_p8 = scmp.lt.u32.totalorder %s842_s30, %s1115_s23 }
  0x49   : > { %p844_p11 = pnand %p843_p6, %p615_p5  ;;  %p849_p3 = por %p848_p2, %p847_p13 }
  0x4b   : > { %p845_p12 = pneg %p844_p11  ;;  %p851_p9 = por %p850_p8, %p849_p3 }
  0x4d   : > { %p852_p10 = pnand %p851_p9, %p845_p12 }
  0x4f   : > { %855 = shalt.err (!%p852_p10)
}
  0x50   : > { %s856_s5 = scalar_lea.vmem %s1117_s14, %s1104_s11  ;;  %s977_s13 = smov [#allocation2]  }
  0x51   : > { %p857_p1 = scmp.ne.s32.totalorder %s1117_s14, %s856_s5  ;;  %s860_s20 = sshll.u32 %s977_s13, 4  ;;  %s861_s20 = int_to_ptr.vmem [resolvable:$false] %s860_s20 }
  0x52   : > { %s862_s22 = scalar_lea.vmem %s861_s20, 1792  ;;  %p863_p4 = scmp.lt.s32.totalorder %s1117_s14, %s861_s20 }
  0x53   : > { %p858_p0 = pnand %p857_p1, %p615_p5  ;;  %p864_p6 = scmp.lt.s32.totalorder %s862_s22, %s856_s5 }
  0x55   : > { %p859_p7 = pneg %p858_p0  ;;  %p865_p11 = por %p864_p6, %p863_p4 }
  0x57   : > { %p866_p13 = pnand %p865_p11, %p859_p7 }
  0x59   : > { %869 = shalt.err (!%p866_p13)
}
  0x5a   : > { %s978_s30 = smov 128   ;;  %s979_s7 = smov 8  }
  0x5b   : > { %200 = dma.hbm_to_vmem [thread:$0]  (%p615_p5), %s1115_s23, %s1104_s11, %s1117_s14, %s1107_s12, %s978_s30, %s978_s30, %s979_s7  }
  0x5c PF: > { %p1311_p12 = scmp.ne.s32.totalorder %s1304_s25, 0 }
  0x5d   : > { %s204_s8 = sand.u32 (%p1311_p12), 1, %s972_s18   ;;  %s206_s9 = sand.u32 (%p1311_p12), 1, %s968_s17  }
  0x5e   : > { %203 = sbr.rel (!%p1311_p12) target bundleno = 129 (0x81), region = 32  ;;  %s1152_s22 = scalar_lea.sflag (%p1311_p12), [#allocation6], %s204_s8 }
  0x5f   : > { %s739_s10 = smul.u32 (%p1311_p12), 56, %s206_s9 }
  0x60   : > { %s209_s6 = smul.u32 (%p1311_p12), 7, %s972_s18 }
  0x61   : > { %s208_s11 = scalar_lea.vmem (%p1311_p12), [#allocation5], %s739_s10 }
  0x62   : > { %s210_s5 = ssub.s32 (%p1311_p12), 25, %s209_s6 }
  0x63   : > { %p211_p2 = scmp.lt.s32.totalorder (%p1311_p12), %s210_s5, 7 }
  0x65   : > { %s1325_s5 = smov (!%p211_p2, %s210_s5), 7 }
  0x66   : > { %s1149_s13 = sshll.u32 %s1325_s5, 7 }
  0x67   : > { %s215_s20 = ssub.s32 896, %s1149_s13 }
  0x68   : > { %216 = vsyncadd %s1152_s22, %s215_s20  ;;  %p620_p5 = scmp.ne.s32.totalorder %s1149_s13, 0  ;;  %s635_s25 = smul.u32 896, %s972_s18 }
  0x69   : > { %s221_s12 = sshll.u32 %s208_s11, 4  ;;  %s874_s10 = scalar_lea.hbm %s1297_s1, 3200  ;;  %s1162_s12 = int_to_ptr.vmem [resolvable:$true] %s221_s12 }
  0x6a   : > { %s1160_s30 = scalar_lea.hbm %s1297_s1, %s635_s25 }
  0x6b   : > { %s870_s7 = scalar_lea.hbm %s1160_s30, %s1149_s13  ;;  %p875_p10 = scmp.lt.u32.totalorder %s1160_s30, %s1297_s1 }
  0x6c   : > { %p871_p3 = scmp.ne.s32.totalorder %s1160_s30, %s870_s7  ;;  %p876_p1 = scmp.lt.u32.totalorder %s874_s10, %s870_s7 }
  0x6d   : > { %p878_p7 = scmp.lt.u32.totalorder %s870_s7, %s1160_s30 }
  0x6e   : > { %p872_p8 = pnand %p871_p3, %p620_p5  ;;  %p877_p0 = por %p876_p1, %p875_p10 }
  0x70   : > { %p873_p9 = pneg %p872_p8  ;;  %p879_p4 = por %p878_p7, %p877_p0 }
  0x72   : > { %p880_p6 = pnand %p879_p4, %p873_p9 }
  0x74   : > { %883 = shalt.err (!%p880_p6)
}
  0x75   : > { %s884_s20 = scalar_lea.vmem %s1162_s12, %s1149_s13  ;;  %s980_s11 = smov [#allocation5]  }
  0x76   : > { %p885_p11 = scmp.ne.s32.totalorder %s1162_s12, %s884_s20  ;;  %s888_s25 = sshll.u32 %s980_s11, 4  ;;  %s889_s25 = int_to_ptr.vmem [resolvable:$false] %s888_s25 }
  0x77   : > { %s890_s14 = scalar_lea.vmem %s889_s25, 1792  ;;  %p891_p2 = scmp.lt.s32.totalorder %s1162_s12, %s889_s25 }
  0x78   : > { %p886_p13 = pnand %p885_p11, %p620_p5  ;;  %p892_p3 = scmp.lt.s32.totalorder %s890_s14, %s884_s20 }
  0x7a   : > { %p887_p12 = pneg %p886_p13  ;;  %p893_p8 = por %p892_p3, %p891_p2 }
  0x7c   : > { %p894_p10 = pnand %p893_p8, %p887_p12 }
  0x7e   : > { %897 = shalt.err (!%p894_p10)
}
  0x7f   : > { %s981_s23 = smov 128   ;;  %s982_s7 = smov 8  }
  0x80   : > { %227 = dma.hbm_to_vmem [thread:$0]  (%p620_p5), %s1160_s30, %s1149_s13, %s1162_s12, %s1152_s22, %s981_s23, %s981_s23, %s982_s7  }
  0x81 PF: > { %p1312_p9 = scmp.ne.s32.totalorder %s1308_s29, 0 }
  0x82   : > { %s1192_s8 = sand.u32 (!%p1312_p9), 1, %s964_s16   ;;  %p1313_p1 = scmp.ne.s32.totalorder (!%p1312_p9), %s1305_s26, 0 }
  0x83   : > { %233 = sbr.rel (%p1312_p9) target bundleno = 449 (0x1c1), region = 36  ;;  %s236_s10 = scalar_lea.sflag (!%p1312_p9), [#allocation3], %s1192_s8 }
  0x84   : > { %s1195_s9 = smul.u32 (!%p1312_p9), 56, %s1192_s8 }
  0x86   : > { %s1199_s6 = scalar_lea.vmem (!%p1312_p9), [#allocation2], %s1195_s9 }
  0x8a   : > { %943 = dma.done.wait (%p1313_p1), %s236_s10, 896  }
  0x8b   : > { %945 = vsyncadd (%p1313_p1), %s236_s10, 4294966400  ;;  %s244_s29 = sand.u32 1, %s1032_s19   ;;  %s1207_s22 = scalar_lea.vmem [#allocation5], %s1195_s9 }
  0x8c   : > { %s245_s13 = scalar_lea.sflag [#allocation6], %s244_s29 }
  0x8d   : > { %947 = dma.done.wait (%p1313_p1), %s245_s13, 896  }
  0x8e   : > { %949 = vsyncadd (%p1313_p1), %s245_s13, 4294966400  ;;  %p1314_p5 = scmp.eq.s32.totalorder %s1032_s19, 0 }
  0x90   : > { %951 = dma.done.wait (%p1314_p5), [#allocation6], 4096   ;;  %p1315_p0 = pmov %p1314_p5 }
  0x91   : > { %v348_v0 = vld [vmem:[#allocation7 + $0x80] sm:$0xff]  ;;  %v349_v1 = vld [vmem:[#allocation7 + $0x88] sm:$0xff]  ;;  %v350_v5 = vld [vmem:[#allocation7 + $0x90] sm:$0xff]  ;;  %s281_s30 = scalar_lea.vmem [#allocation8], %s1195_s9  ;;  %s486_s5 = scalar_lea.sflag [#allocation4], %s1192_s8 }
  0x92   : > { %953 = vsyncadd (%p1315_p0), [#allocation6], 4294963200  ;;  %v332_v2 = vld [vmem:[#allocation7] sm:$0xff]  ;;  %v690_v3 = vpack.c.bf16 %v349_v1, %v348_v0  ;;  %v333_v4 = vld [vmem:[#allocation7 + $0x8] sm:$0xff]  ;;  %p1316_p7 = scmp.ne.s32.totalorder %s1306_s27, 0 }
  0x93   : > { %v351_v6 = vld [vmem:[#allocation7 + $0x98] sm:$0xff]  ;;  %v692_v7 = vpack.c.bf16 %v333_v4, %v332_v2  ;;  %v334_v9 = vld [vmem:[#allocation7 + $0x10] sm:$0xff]  ;;  %v352_v11 = vld [vmem:[#allocation7 + $0xa0] sm:$0xff]  ;;  %s493_s20 = smul.u32 (%p1316_p7), 7, %s1032_s19 }
  0x94   : > { %v694_v8 = vpack.c.bf16 %v351_v6, %v350_v5  ;;  %v335_v10 = vld [vmem:[#allocation7 + $0x18] sm:$0xff]  ;;  %691 = vmatprep.subr.bf16.mxu0 %v690_v3  ;;  %722 = vmatprep.subr.bf16.mxu1 %v690_v3  ;;  %v353_v12 = vld [vmem:[#allocation7 + $0xa8] sm:$0xff]  ;;  %v336_v15 = vld [vmem:[#allocation7 + $0x20] sm:$0xff] }
  0x95   : > { %693 = vmatpush3.bf16.msra.mxu0 %v692_v7  ;;  %730 = vmatpush3.bf16.msra.mxu1 %v692_v7  ;;  %v696_v13 = vpack.c.bf16 %v335_v10, %v334_v9  ;;  %v698_v14 = vpack.c.bf16 %v353_v12, %v352_v11  ;;  %v337_v16 = vld [vmem:[#allocation7 + $0x28] sm:$0xff]  ;;  %v354_v17 = vld [vmem:[#allocation7 + $0xb0] sm:$0xff]  ;;  %v355_v18 = vld [vmem:[#allocation7 + $0xb8] sm:$0xff]  ;;  %s494_s11 = ssub.s32 (%p1316_p7), 25, %s493_s20 }
  0x96   : > { %695 = vmatprep.subr.bf16.mxu0 %v694_v8  ;;  %723 = vmatprep.subr.bf16.mxu1 %v694_v8  ;;  %v700_v19 = vpack.c.bf16 %v337_v16, %v336_v15  ;;  %v702_v20 = vpack.c.bf16 %v355_v18, %v354_v17  ;;  %v338_v21 = vld [vmem:[#allocation7 + $0x30] sm:$0xff]  ;;  %v339_v22 = vld [vmem:[#allocation7 + $0x38] sm:$0xff]  ;;  %v356_v23 = vld [vmem:[#allocation7 + $0xc0] sm:$0xff]  ;;  %p495_p4 = scmp.lt.s32.totalorder (%p1316_p7), %s494_s11, 7 }
  0x97   : > { %v357_v24 = vld [vmem:[#allocation7 + $0xc8] sm:$0xff]  ;;  %v297_v25 = vld [vmem:[%s1199_s6] sm:$0xff]  ;;  %v704_v29 = vpack.c.bf16 %v339_v22, %v338_v21  ;;  %v358_v35 = vld [vmem:[#allocation7 + $0xd0] sm:$0xff] }
  0x98   : > { %v304_v26 = vld [vmem:[%s1207_s22] sm:$0xff]  ;;  %v301_v27 = vld [vmem:[%s1199_s6 + $0x20] sm:$0xff]  ;;  %v706_v31 = vpack.c.bf16 %v357_v24, %v356_v23  ;;  %v298_v55 = vld [vmem:[%s1199_s6 + $0x8] sm:$0xff] }
  0x99   : > { %697 = vmatpush3.bf16.msra.mxu0 %v696_v13  ;;  %731 = vmatpush3.bf16.msra.mxu1 %v696_v13  ;;  %v308_v28 = vld [vmem:[%s1207_s22 + $0x20] sm:$0xff]  ;;  %v325_v30 = vmul.f32 %v304_v26, %v297_v25  ;;  %v340_v32 = vld [vmem:[#allocation7 + $0x40] sm:$0xff]  ;;  %v359_v36 = vld [vmem:[#allocation7 + $0xd8] sm:$0xff]  ;;  %v311_v53 = vsub.f32 %v297_v25, %v304_v26 }
  0x9a   : > { %699 = vmatprep.subr.bf16.mxu0 %v698_v14  ;;  %724 = vmatprep.subr.bf16.mxu1 %v698_v14  ;;  %v341_v33 = vld [vmem:[#allocation7 + $0x48] sm:$0xff]  ;;  %v329_v34 = vmul.f32 %v308_v28, %v301_v27  ;;  %v710_v38 = vpack.c.bf16 %v359_v36, %v358_v35  ;;  %v342_v39 = vld [vmem:[#allocation7 + $0x50] sm:$0xff]  ;;  %v343_v40 = vld [vmem:[#allocation7 + $0x58] sm:$0xff]  ;;  %v315_v54 = vsub.f32 %v301_v27, %v308_v28 }
  0x9b   : > { %435 = vmatprep.mubr.f32.mxu0 %v325_v30  ;;  %v708_v37 = vpack.c.bf16 %v341_v33, %v340_v32  ;;  %v360_v41 = vld [vmem:[#allocation7 + $0xe0] sm:$0xff]  ;;  %v361_v42 = vld [vmem:[#allocation7 + $0xe8] sm:$0xff]  ;;  %v712_v43 = vpack.c.bf16 %v343_v40, %v342_v39  ;;  %v362_v47 = vld [vmem:[#allocation7 + $0xf0] sm:$0xff]  ;;  %v318_v61 = vmul.f32 %v311_v53, %v311_v53 }
  0x9c   : > { %455 = vmatprep.mubr.f32.mxu1 %v329_v34  ;;  %v714_v44 = vpack.c.bf16 %v361_v42, %v360_v41  ;;  %v344_v45 = vld [vmem:[#allocation7 + $0x60] sm:$0xff]  ;;  %v345_v46 = vld [vmem:[#allocation7 + $0x68] sm:$0xff]  ;;  %v363_v48 = vld [vmem:[#allocation7 + $0xf8] sm:$0xff]  ;;  %v322_v62 = vmul.f32 %v315_v54, %v315_v54 }
  0x9d   : > { %701 = vmatpush3.bf16.msra.mxu0 %v700_v19  ;;  %732 = vmatpush3.bf16.msra.mxu1 %v700_v19  ;;  %v716_v49 = vpack.c.bf16 %v345_v46, %v344_v45  ;;  %v718_v50 = vpack.c.bf16 %v363_v48, %v362_v47  ;;  %v346_v51 = vld [vmem:[#allocation7 + $0x70] sm:$0xff]  ;;  %v347_v52 = vld [vmem:[#allocation7 + $0x78] sm:$0xff]  ;;  %v302_v58 = vld [vmem:[%s1199_s6 + $0x28] sm:$0xff] }
  0x9e   : > { %703 = vmatprep.subr.bf16.mxu0 %v702_v20  ;;  %725 = vmatprep.subr.bf16.mxu1 %v702_v20  ;;  %v305_v56 = vld [vmem:[%s1207_s22 + $0x8] sm:$0xff]  ;;  %v720_v57 = vpack.c.bf16 %v347_v52, %v346_v51  ;;  %v299_v63 = vld [vmem:[%s1199_s6 + $0x10] sm:$0xff]  ;;  %v306_v3 = vld [vmem:[%s1207_s22 + $0x10] sm:$0xff] }
  0x9f   : > { %v309_v59 = vld [vmem:[%s1207_s22 + $0x28] sm:$0xff]  ;;  %v312_v60 = vsub.f32 %v298_v55, %v305_v56  ;;  %v326_v1 = vmul.f32 %v305_v56, %v298_v55  ;;  %v303_v4 = vld [vmem:[%s1199_s6 + $0x30] sm:$0xff]  ;;  %v310_v5 = vld [vmem:[%s1207_s22 + $0x30] sm:$0xff]  ;;  %v313_v8 = vsub.f32 %v299_v63, %v306_v3  ;;  %v327_v10 = vmul.f32 %v306_v3, %v299_v63 }
  0xa0   : > { %v316_v0 = vsub.f32 %v302_v58, %v309_v59  ;;  %v330_v2 = vmul.f32 %v309_v59, %v302_v58  ;;  %v317_v9 = vsub.f32 %v303_v4, %v310_v5  ;;  %v331_v11 = vmul.f32 %v310_v5, %v303_v4  ;;  %v300_v12 = vld [vmem:[%s1199_s6 + $0x18] sm:$0xff]  ;;  %v307_v13 = vld [vmem:[%s1207_s22 + $0x18] sm:$0xff] }
  0xa1   : > { %705 = vmatpush3.bf16.msra.mxu0 %v704_v29  ;;  %733 = vmatpush3.bf16.msra.mxu1 %v704_v29  ;;  %v319_v6 = vmul.f32 %v312_v60, %v312_v60  ;;  %v320_v14 = vmul.f32 %v313_v8, %v313_v8  ;;  %v314_v16 = vsub.f32 %v300_v12, %v307_v13  ;;  %v626_v21 = vld [vmem:[%s1299_s3] ss:$0 sm:$0xff] }
  0xa2   : > { %707 = vmatprep.subr.bf16.mxu0 %v706_v31  ;;  %726 = vmatprep.subr.bf16.mxu1 %v706_v31  ;;  %v323_v7 = vmul.f32 %v316_v0, %v316_v0  ;;  %v324_v15 = vmul.f32 %v317_v9, %v317_v9  ;;  %v328_v17 = vmul.f32 %v307_v13, %v300_v12 }
  0xa3   : > { %v321_v18 = vmul.f32 %v314_v16, %v314_v16 }
  0xa5   : > { %709 = vmatpush3.bf16.msra.mxu0 %v708_v37  ;;  %734 = vmatpush3.bf16.msra.mxu1 %v708_v37 }
  0xa6   : > { %711 = vmatprep.subr.bf16.mxu0 %v710_v38  ;;  %727 = vmatprep.subr.bf16.mxu1 %v710_v38 }
  0xa9   : > { %713 = vmatpush3.bf16.msra.mxu0 %v712_v43  ;;  %735 = vmatpush3.bf16.msra.mxu1 %v712_v43 }
  0xaa   : > { %715 = vmatprep.subr.bf16.mxu0 %v714_v44  ;;  %728 = vmatprep.subr.bf16.mxu1 %v714_v44 }
  0xad   : > { %717 = vmatpush3.bf16.msra.mxu0 %v716_v49  ;;  %736 = vmatpush3.bf16.msra.mxu1 %v716_v49 }
  0xae   : > { %719 = vmatprep.subr.bf16.mxu0 %v718_v50  ;;  %729 = vmatprep.subr.bf16.mxu1 %v718_v50 }
  0xb1   : > { %721 = vmatpush3.bf16.msra.mxu0 %v720_v57  ;;  %737 = vmatpush3.bf16.msra.mxu1 %v720_v57 }
  0xb4   : > { %436 = vmatmul.mubr.f32.vlgmr.msra.gmra.mrb[0].mxu0 %v318_v61  ;;  %456 = vmatmul.mubr.f32.vlgmr.msra.gmra.mrb[0].mxu1 %v322_v62 }
  0xb5   : > { %440 = vmatprep.mubr.f32.mxu0 %v326_v1  ;;  %460 = vmatprep.mubr.f32.mxu1 %v330_v2 }
  0xb8   : > { %441 = vmatmul.mubr.f32.gmra.mrb[2].mxu0 %v319_v6  ;;  %461 = vmatmul.mubr.f32.gmra.mrb[2].mxu1 %v323_v7 }
  0xb9   : > { %445 = vmatprep.mubr.f32.mxu0 %v327_v10  ;;  %465 = vmatprep.mubr.f32.mxu1 %v331_v11 }
  0xbc   : > { %446 = vmatmul.mubr.f32.gmra.mrb[4].mxu0 %v320_v14  ;;  %466 = vmatmul.mubr.f32.gmra.mrb[4].mxu1 %v324_v15 }
  0xbd   : > { %450 = vmatprep.mubr.f32.mxu0 %v328_v17 }
  0xc0   : > { %451 = vmatmul.mubr.f32.gmra.mrb[6].mxu0 %v321_v18 }
 0x187   : > { %v669_v19 = vpop.f32.mrb[0].mxu0  ;;  %v681_v20 = vpop.f32.mrb[0].mxu1 }
 0x188   : > { %v670_v22 = vpop.f32.mrb[1].mxu0  ;;  %v682_v23 = vpop.f32.mrb[1].mxu1 }
 0x189   : > { %v671_v24 = vadd.f32 %v670_v22, %v669_v19  ;;  %v683_v25 = vadd.f32 %v682_v23, %v681_v20 }
 0x18b   : > { %v438_v26 = vadd.f32 %v671_v24, %v626_v21  ;;  %v672_v27 = vpop.f32.mrb[2].mxu0  ;;  %v458_v28 = vadd.f32 %v683_v25, %v626_v21  ;;  %v684_v29 = vpop.f32.mrb[2].mxu1 }
 0x18c   : > { %v673_v30 = vpop.f32.mrb[3].mxu0  ;;  %v685_v31 = vpop.f32.mrb[3].mxu1 }
 0x18d   : > { %800 = vtanh.f32 %v438_v26  ;;  %v674_v32 = vadd.f32 %v673_v30, %v672_v27  ;;  %v686_v33 = vadd.f32 %v685_v31, %v684_v29 }
 0x18e   : > { %802 = vtanh.f32 %v458_v28 }
 0x18f   : > { %v443_v34 = vadd.f32 %v674_v32, %v626_v21  ;;  %v675_v35 = vpop.f32.mrb[4].mxu0  ;;  %v463_v36 = vadd.f32 %v686_v33, %v626_v21  ;;  %v687_v37 = vpop.f32.mrb[4].mxu1 }
 0x190   : > { %v676_v38 = vpop.f32.mrb[5].mxu0  ;;  %v688_v39 = vpop.f32.mrb[5].mxu1 }
 0x191   : > { %804 = vtanh.f32 %v443_v34  ;;  %v677_v40 = vadd.f32 %v676_v38, %v675_v35  ;;  %v689_v41 = vadd.f32 %v688_v39, %v687_v37 }
 0x192   : > { %806 = vtanh.f32 %v463_v36 }
 0x193   : > { %v448_v42 = vadd.f32 %v677_v40, %v626_v21  ;;  %v678_v43 = vpop.f32.mrb[6].mxu0  ;;  %v468_v44 = vadd.f32 %v689_v41, %v626_v21 }
 0x194   : > { %v679_v45 = vpop.f32.mrb[7].mxu0 }
 0x195   : > { %808 = vtanh.f32 %v448_v42  ;;  %v680_v46 = vadd.f32 %v679_v45, %v678_v43 }
 0x196   : > { %810 = vtanh.f32 %v468_v44 }
 0x197   : > { %v801_v47 = vpop.eup %800  ;;  %v453_v48 = vadd.f32 %v680_v46, %v626_v21 }
 0x198   : > { %v803_v49 = vpop.eup %802  ;;  %478 = vst [vmem:[%s281_s30] sm:$0xff] %v801_v47 }
 0x199   : > { %482 = vst [vmem:[%s281_s30 + $0x20] sm:$0xff] %v803_v49  ;;  %812 = vtanh.f32 %v453_v48 }
 0x19b   : > { %v805_v50 = vpop.eup %804 }
 0x19c   : > { %v807_v51 = vpop.eup %806  ;;  %479 = vst [vmem:[%s281_s30 + $0x8] sm:$0xff] %v805_v50 }
 0x19d   : > { %483 = vst [vmem:[%s281_s30 + $0x28] sm:$0xff] %v807_v51 }
 0x19e   : > { %492 = sbr.rel (!%p1316_p7) target bundleno = 449 (0x1c1), region = 52 }
 0x19f   : > { %v809_v52 = vpop.eup %808 }
 0x1a0   : > { %v811_v53 = vpop.eup %810  ;;  %480 = vst [vmem:[%s281_s30 + $0x10] sm:$0xff] %v809_v52 }
 0x1a1   : > { %484 = vst [vmem:[%s281_s30 + $0x30] sm:$0xff] %v811_v53 }
 0x1a3   : > { %v813_v54 = vpop.eup %812 }
 0x1a4   : > { %481 = vst [vmem:[%s281_s30 + $0x18] sm:$0xff] %v813_v54 }
 0x1a5   : > { %s1327_s11 = smov (!%p495_p4, %s494_s11), 7 }
 0x1a6   : > { %s1239_s25 = sshll.u32 %s1327_s11, 7 }
 0x1a7   : > { %s499_s14 = ssub.s32 896, %s1239_s25 }
 0x1a8   : > { %500 = vsyncadd %s486_s5, %s499_s14  ;;  %p628_p6 = scmp.ne.s32.totalorder %s1239_s25, 0  ;;  %s636_s23 = smul.u32 896, %s1032_s19 }
 0x1a9   : > { %s505_s27 = sshll.u32 %s281_s30, 4  ;;  %s983_s29 = smov [#allocation8]   ;;  %s1251_s27 = int_to_ptr.vmem [resolvable:$true] %s505_s27 }
 0x1aa   : > { %s1249_s10 = scalar_lea.hbm %s1300_s4, %s636_s23  ;;  %s898_s6 = scalar_lea.vmem %s1251_s27, %s1239_s25 }
 0x1ab   : > { %p899_p11 = scmp.ne.s32.totalorder %s1251_s27, %s898_s6  ;;  %s902_s13 = sshll.u32 %s983_s29, 4  ;;  %s903_s13 = int_to_ptr.vmem [resolvable:$false] %s902_s13 }
 0x1ac   : > { %s904_s19 = scalar_lea.vmem %s903_s13, 1792  ;;  %p905_p2 = scmp.lt.s32.totalorder %s1251_s27, %s903_s13 }
 0x1ad   : > { %p900_p13 = pnand %p899_p11, %p628_p6  ;;  %p906_p3 = scmp.lt.s32.totalorder %s904_s19, %s898_s6 }
 0x1af   : > { %p901_p12 = pneg %p900_p13  ;;  %p907_p8 = por %p906_p3, %p905_p2 }
 0x1b1   : > { %p908_p10 = pnand %p907_p8, %p901_p12 }
 0x1b3   : > { %911 = shalt.err (!%p908_p10)
}
 0x1b4   : > { %s912_s22 = scalar_lea.hbm %s1249_s10, %s1239_s25  ;;  %s916_s30 = scalar_lea.hbm %s1300_s4, 3200 }
 0x1b5   : > { %p913_p9 = scmp.ne.s32.totalorder %s1249_s10, %s912_s22  ;;  %p917_p0 = scmp.lt.u32.totalorder %s1249_s10, %s1300_s4 }
 0x1b6   : > { %p918_p7 = scmp.lt.u32.totalorder %s916_s30, %s912_s22  ;;  %p920_p11 = scmp.lt.u32.totalorder %s912_s22, %s1249_s10 }
 0x1b7   : > { %p914_p1 = pnand %p913_p9, %p628_p6 }
 0x1b8   : > { %p919_p4 = por %p918_p7, %p917_p0 }
 0x1b9   : > { %p915_p5 = pneg %p914_p1 }
 0x1ba   : > { %p921_p13 = por %p920_p11, %p919_p4 }
 0x1bc   : > { %p922_p12 = pnand %p921_p13, %p915_p5 }
 0x1be   : > { %925 = shalt.err (!%p922_p12)
}
 0x1bf   : > { %s984_s14 = smov 128   ;;  %s985_s23 = smov 8  }
 0x1c0   : > { %511 = dma.vmem_to_hbm [thread:$0]  (%p628_p6), %s1251_s27, %s1239_s25, %s1249_s10, %s486_s5, %s984_s14, %s984_s14, %s985_s23  }
 0x1c1 PF: > { %p758_p2 = scmp.ge.s32.totalorder %s972_s18, 2  ;;  %s520_s7 = sand.u32 1, %s960_s15  }
 0x1c2   : > { %p1317_p3 = scmp.ne.s32.totalorder %s1307_s28, 0  ;;  %s521_s9 = scalar_lea.sflag [#allocation4], %s520_s7 }
 0x1c4   : > { %p753_p8 = pnand %p758_p2, %p1317_p3 }
 0x1c6   : > { %955 = dma.done.wait (!%p753_p8), %s521_s9, 896  }
 0x1c7   : > { %957 = vsyncadd (!%p753_p8), %s521_s9, 4294966400  ;;  %p20_p10 = scmp.ge.s32.totalorder %s1036_s21, 6   ;;  %s1318_s15 = smov %s964_s16 }
 0x1c8   : > { %s1319_s16 = smov %s968_s17  ;;  %s1320_s17 = smov %s1048_s24 }
 0x1c9   : > { %s1321_s18 = smov %s1036_s21  ;;  %22 = sbr.rel (!%p20_p10) target bundleno = 7 (0x7), region = 98 }
 0x1d0   :  { %526 = vsyncpa [#allocation3], 1 }
 0x1d1   :  { %528 = vsyncpa [#allocation3 + $0x1], 1 }
 0x1d2   :  { %529 = vsyncpa [#allocation6], 1 }
 0x1d3   :  { %531 = vsyncpa [#allocation6 + $0x1], 1 }
 0x1d4   :  { %532 = vsyncpa [#allocation4], 1 }
 0x1d5   :  { %534 = vsyncpa [#allocation4 + $0x1], 1 }

</bundles_post_ra>
